<compile_context>
chip_gen: v6e
topology: v6e:2x2x1
jax: 0.10.0
libtpu: 0.0.40
codegen_flags: <defaults>
</compile_context>

<pallas_src>
import jax
import jax.numpy as jnp
from jax.experimental import pallas as pl
from jax.experimental.pallas import tpu as pltpu

_HALO = 8  # sublane-tile-aligned halo offset inside the padded scratch


def _denoiser_kernel(x_ref,
                     w1_ref, b1_ref, w2_ref, b2_ref,
                     w3_ref, b3_ref, w4_ref, b4_ref,
                     diff_ref, recon_ref, pad_ref):
    B, L, cin = x_ref.shape
    cpad = diff_ref.shape[-1]          # lane-dense output width (multiple of 128)
    hidden = w1_ref.shape[-1]

    # Zero the padded scratch once: halo rows and the channels beyond the live
    # width stay zero for the rest of the kernel.
    pad_ref[...] = jnp.zeros_like(pad_ref)

    def conv(mid, w_ref, b_ref):
        """Conv1d(k=3, pad=1) as ONE im2col matmul.

        `mid` (B, L, C) must already be stored at pad_ref[:, HALO:HALO+L, :C].
        Weights are pre-flattened tap-major: (3C, Cout).
        """
        C = mid.shape[-1]
        left = pad_ref[:, _HALO - 1:_HALO - 1 + L, :C]    # x[l-1] (zero halo row)
        right = pad_ref[:, _HALO + 1:_HALO + 1 + L, :C]   # x[l+1] (zero halo row)
        xk = jnp.concatenate([left, mid, right], axis=-1)  # (B, L, 3C)
        xk = xk.reshape(B * L, 3 * C).astype(w_ref.dtype)
        y = jnp.dot(xk, w_ref[...], preferred_element_type=jnp.float32)
        return y + b_ref[...]                               # (B*L, Cout) f32

    x = x_ref[...]                                          # (B, L, Cin)
    pad_ref[:, _HALO:_HALO + L, :cin] = x
    # x zero-padded to `cpad` lanes (for the lane-dense diff store).
    x_pad = pad_ref[:, _HALO:_HALO + L, :].reshape(B * L, cpad)

    # encoder
    h = jnp.maximum(conv(x, w1_ref, b1_ref), 0.0).reshape(B, L, hidden)
    pad_ref[:, _HALO:_HALO + L, :hidden] = h
    h = jnp.maximum(conv(h, w2_ref, b2_ref), 0.0).reshape(B, L, hidden)
    pad_ref[:, _HALO:_HALO + L, :hidden] = h
    # decoder
    h = jnp.maximum(conv(h, w3_ref, b3_ref), 0.0).reshape(B, L, hidden)
    pad_ref[:, _HALO:_HALO + L, :hidden] = h
    recon_pad = conv(h, w4_ref, b4_ref)                     # (B*L, cpad)

    recon_ref[...] = recon_pad
    diff_ref[...] = x_pad - recon_pad


def denoiser_autoenc(x, params, *, use_bf16_matmul=False):
    """x: (B, L, Cin) f32.  params: 4x (w (3,Cin,Cout) tap-major, b (1,Cout)).

    Returns (diff, recon), both (B, L, Cin) f32 — same semantics as the
    PyTorch module's (permuted-back) outputs.
    """
    B, L, cin = x.shape
    (w1, b1), (w2, b2), (w3, b3), (w4, b4) = params
    hidden = w1.shape[2]
    cpad = max(cin, hidden, 128)
    cpad = ((cpad + 127) // 128) * 128

    mxu_dtype = jnp.bfloat16 if use_bf16_matmul else jnp.float32
    flat = lambda w: w.reshape(w.shape[0] * w.shape[1], w.shape[2]).astype(mxu_dtype)
    w1f, w2f, w3f = flat(w1), flat(w2), flat(w3)
    # Zero-pad the last layer's output channels to `cpad` so the final matmul
    # fills 128 lanes and the recon/diff stores are unmasked (lane-dense).
    w4f = jnp.pad(flat(w4), ((0, 0), (0, cpad - cin)))
    b4p = jnp.pad(b4, ((0, 0), (0, cpad - cin)))

    full = lambda a: pl.BlockSpec(a.shape, lambda i: (0,) * a.ndim)
    out_flat = jax.ShapeDtypeStruct((B * L, cpad), jnp.float32)

    diff_flat, recon_flat = pl.pallas_call(
        _denoiser_kernel,
        out_shape=(out_flat, out_flat),
        grid_spec=pltpu.PrefetchScalarGridSpec(
            num_scalar_prefetch=0,
            grid=(1,),                       # single invocation: whole batch
            in_specs=[
                full(x),
                full(w1f), full(b1),
                full(w2f), full(b2),
                full(w3f), full(b3),
                full(w4f), full(b4p),
            ],
            out_specs=[
                pl.BlockSpec((B * L, cpad), lambda i: (0, 0)),
                pl.BlockSpec((B * L, cpad), lambda i: (0, 0)),
            ],
            scratch_shapes=[pltpu.VMEM((B, L + 2 * _HALO, cpad), jnp.float32)],
        ),
        compiler_params=pltpu.CompilerParams(
            dimension_semantics=("arbitrary",)),
    )(x, w1f, b1, w2f, b2, w3f, b3, w4f, b4p)

    diff = diff_flat[:, :cin].reshape(B, L, cin)
    recon = recon_flat[:, :cin].reshape(B, L, cin)
    return diff, recon


def init_params(key, in_ch=4, hidden=32):
    """Deterministic parameter init.  Conv weights stored tap-major:
    (3, Cin, Cout) == torch (Cout, Cin, 3) transposed (2, 1, 0)."""
    dims = [(in_ch, hidden), (hidden, hidden), (hidden, hidden), (hidden, in_ch)]
    params = []
    for (cin, cout) in dims:
        key, kw, kb = jax.random.split(key, 3)
        bound = 1.0 / jnp.sqrt(cin * 3.0)            # PyTorch Conv1d default scale
        w = jax.random.uniform(kw, (3, cin, cout), jnp.float32, -bound, bound)
        b = jax.random.uniform(kb, (1, cout), jnp.float32, -bound, bound)
        params.append((w, b))
    return params


def reference(x, params):
    """Pure-JAX reference (channels-last conv1d, k=3, pad=1)."""
    def conv(x, w, b):
        zr = jnp.zeros_like(x[:, :1])
        xm = jnp.concatenate([zr, x[:, :-1]], axis=1)
        xp = jnp.concatenate([x[:, 1:], zr], axis=1)
        return (jnp.einsum('blc,co->blo', xm, w[0])
                + jnp.einsum('blc,co->blo', x, w[1])
                + jnp.einsum('blc,co->blo', xp, w[2]) + b)
    (w1, b1), (w2, b2), (w3, b3), (w4, b4) = params
    h = jax.nn.relu(conv(x, w1, b1))
    h = jax.nn.relu(conv(h, w2, b2))
    h = jax.nn.relu(conv(h, w3, b3))
    recon = conv(h, w4, b4)
    return x - recon, recon


if __name__ == "__main__":
    key = jax.random.PRNGKey(0)
    kx, kp = jax.random.split(key)

    B, L, C_IN, HIDDEN = 2, 16, 4, 32
    x = jax.random.normal(kx, (B, L, C_IN), jnp.float32)   # (batch, seq, channels)
    params = init_params(kp, in_ch=C_IN, hidden=HIDDEN)

    diff, recon = denoiser_autoenc(x, params)
    jax.block_until_ready((diff, recon))

    diff_want, recon_want = reference(x, params)
    assert jnp.allclose(diff, diff_want, atol=1e-5, rtol=1e-5)
    assert jnp.allclose(recon, recon_want, atol=1e-5, rtol=1e-5)

    print("KERNEL_OK")
</pallas_src>

<mosaic_0001>
module attributes {stable_mosaic.version = 11 : i64} {
  func.func @_denoiser_kernel(%arg0: i32, %arg1: memref<2x16x4xf32, #tpu.memory_space<vmem>>, %arg2: memref<12x32xf32, #tpu.memory_space<vmem>>, %arg3: memref<1x32xf32, #tpu.memory_space<vmem>>, %arg4: memref<96x32xf32, #tpu.memory_space<vmem>>, %arg5: memref<1x32xf32, #tpu.memory_space<vmem>>, %arg6: memref<96x32xf32, #tpu.memory_space<vmem>>, %arg7: memref<1x32xf32, #tpu.memory_space<vmem>>, %arg8: memref<96x128xf32, #tpu.memory_space<vmem>>, %arg9: memref<1x128xf32, #tpu.memory_space<vmem>>, %arg10: memref<32x128xf32, #tpu.memory_space<vmem>>, %arg11: memref<32x128xf32, #tpu.memory_space<vmem>>, %arg12: memref<2x32x128xf32, #tpu.memory_space<vmem>>) attributes {dimension_semantics = [#tpu.dimension_semantics<arbitrary>], iteration_bounds = array<i64: 1>, scalar_prefetch = 0 : i64, scratch_operands = 1 : i64, tpu.core_type = #tpu.core_type<tc>, window_params = [{pipeline_mode = #tpu.pipeline_mode<synchronous>, transform_indices = @transform_0, window_bounds = array<i64: 2, 16, 4>}, {pipeline_mode = #tpu.pipeline_mode<synchronous>, transform_indices = @transform_1, window_bounds = array<i64: 12, 32>}, {pipeline_mode = #tpu.pipeline_mode<synchronous>, transform_indices = @transform_2, window_bounds = array<i64: 1, 32>}, {pipeline_mode = #tpu.pipeline_mode<synchronous>, transform_indices = @transform_3, window_bounds = array<i64: 96, 32>}, {pipeline_mode = #tpu.pipeline_mode<synchronous>, transform_indices = @transform_4, window_bounds = array<i64: 1, 32>}, {pipeline_mode = #tpu.pipeline_mode<synchronous>, transform_indices = @transform_5, window_bounds = array<i64: 96, 32>}, {pipeline_mode = #tpu.pipeline_mode<synchronous>, transform_indices = @transform_6, window_bounds = array<i64: 1, 32>}, {pipeline_mode = #tpu.pipeline_mode<synchronous>, transform_indices = @transform_7, window_bounds = array<i64: 96, 128>}, {pipeline_mode = #tpu.pipeline_mode<synchronous>, transform_indices = @transform_8, window_bounds = array<i64: 1, 128>}, {pipeline_mode = #tpu.pipeline_mode<synchronous>, transform_indices = @transform_9, window_bounds = array<i64: 32, 128>}, {pipeline_mode = #tpu.pipeline_mode<synchronous>, transform_indices = @transform_10, window_bounds = array<i64: 32, 128>}]} {
    %cst = arith.constant 0.000000e+00 : f32
    %0 = vector.broadcast %cst : f32 to vector<2x32x128xf32>
    %c0 = arith.constant 0 : index
    %c0_0 = arith.constant 0 : index
    %c0_1 = arith.constant 0 : index
    %1 = vector.load %arg12[%c0, %c0_0, %c0_1] : memref<2x32x128xf32, #tpu.memory_space<vmem>>, vector<2x32x128xf32>
    tpu.vector_store %arg12[%c0, %c0_0, %c0_1], %0 {strides = array<i32>} : memref<2x32x128xf32, #tpu.memory_space<vmem>>, vector<2x32x128xf32>,
    %c0_2 = arith.constant 0 : index
    %c0_3 = arith.constant 0 : index
    %c0_4 = arith.constant 0 : index
    %2 = vector.load %arg1[%c0_2, %c0_3, %c0_4] : memref<2x16x4xf32, #tpu.memory_space<vmem>>, vector<2x16x4xf32>
    %c0_5 = arith.constant 0 : index
    %c8 = arith.constant 8 : index
    %c0_6 = arith.constant 0 : index
    %3 = vector.load %arg12[%c0_5, %c8, %c0_6] : memref<2x32x128xf32, #tpu.memory_space<vmem>>, vector<2x16x4xf32>
    tpu.vector_store %arg12[%c0_5, %c8, %c0_6], %2 {strides = array<i32>} : memref<2x32x128xf32, #tpu.memory_space<vmem>>, vector<2x16x4xf32>,
    %c0_7 = arith.constant 0 : index
    %c8_8 = arith.constant 8 : index
    %c0_9 = arith.constant 0 : index
    %4 = vector.load %arg12[%c0_7, %c8_8, %c0_9] : memref<2x32x128xf32, #tpu.memory_space<vmem>>, vector<2x16x128xf32>
    %5 = vector.shape_cast %4 : vector<2x16x128xf32> to vector<32x128xf32>
    %c0_10 = arith.constant 0 : index
    %c7 = arith.constant 7 : index
    %c0_11 = arith.constant 0 : index
    %6 = vector.load %arg12[%c0_10, %c7, %c0_11] : memref<2x32x128xf32, #tpu.memory_space<vmem>>, vector<2x16x4xf32>
    %c0_12 = arith.constant 0 : index
    %c9 = arith.constant 9 : index
    %c0_13 = arith.constant 0 : index
    %7 = vector.load %arg12[%c0_12, %c9, %c0_13] : memref<2x32x128xf32, #tpu.memory_space<vmem>>, vector<2x16x4xf32>
    %8 = tpu.concatenate %6, %2, %7 in 2 : vector<2x16x4xf32>, vector<2x16x4xf32>, vector<2x16x4xf32> -> vector<2x16x12xf32>
    %9 = vector.shape_cast %8 : vector<2x16x12xf32> to vector<32x12xf32>
    %c0_14 = arith.constant 0 : index
    %c0_15 = arith.constant 0 : index
    %10 = vector.load %arg2[%c0_14, %c0_15] : memref<12x32xf32, #tpu.memory_space<vmem>>, vector<12x32xf32>
    %cst_16 = arith.constant dense<0.000000e+00> : vector<32x32xf32>
    %11 = tpu.matmul %9, %10, %cst_16 {dimension_numbers = #tpu.dot_dimension_numbers<[1], [0], [0], [1], [0, 0, 1, 1], [], []>} : vector<32x12xf32>, vector<12x32xf32>, vector<32x32xf32> -> vector<32x32xf32>
    %c0_17 = arith.constant 0 : index
    %c0_18 = arith.constant 0 : index
    %12 = vector.load %arg3[%c0_17, %c0_18] : memref<1x32xf32, #tpu.memory_space<vmem>>, vector<1x32xf32>
    %13 = vector.broadcast %12 : vector<1x32xf32> to vector<32x32xf32>
    %14 = arith.addf %11, %13 : vector<32x32xf32>
    %cst_19 = arith.constant 0.000000e+00 : f32
    %15 = vector.broadcast %cst_19 : f32 to vector<32x32xf32>
    %16 = arith.maximumf %14, %15 : vector<32x32xf32>
    %17 = vector.shape_cast %16 : vector<32x32xf32> to vector<2x16x32xf32>
    %c0_20 = arith.constant 0 : index
    %c8_21 = arith.constant 8 : index
    %c0_22 = arith.constant 0 : index
    %18 = vector.load %arg12[%c0_20, %c8_21, %c0_22] : memref<2x32x128xf32, #tpu.memory_space<vmem>>, vector<2x16x32xf32>
    tpu.vector_store %arg12[%c0_20, %c8_21, %c0_22], %17 {strides = array<i32>} : memref<2x32x128xf32, #tpu.memory_space<vmem>>, vector<2x16x32xf32>,
    %c0_23 = arith.constant 0 : index
    %c7_24 = arith.constant 7 : index
    %c0_25 = arith.constant 0 : index
    %19 = vector.load %arg12[%c0_23, %c7_24, %c0_25] : memref<2x32x128xf32, #tpu.memory_space<vmem>>, vector<2x16x32xf32>
    %c0_26 = arith.constant 0 : index
    %c9_27 = arith.constant 9 : index
    %c0_28 = arith.constant 0 : index
    %20 = vector.load %arg12[%c0_26, %c9_27, %c0_28] : memref<2x32x128xf32, #tpu.memory_space<vmem>>, vector<2x16x32xf32>
    %21 = tpu.concatenate %19, %17, %20 in 2 : vector<2x16x32xf32>, vector<2x16x32xf32>, vector<2x16x32xf32> -> vector<2x16x96xf32>
    %22 = vector.shape_cast %21 : vector<2x16x96xf32> to vector<32x96xf32>
    %c0_29 = arith.constant 0 : index
    %c0_30 = arith.constant 0 : index
    %23 = vector.load %arg4[%c0_29, %c0_30] : memref<96x32xf32, #tpu.memory_space<vmem>>, vector<96x32xf32>
    %cst_31 = arith.constant dense<0.000000e+00> : vector<32x32xf32>
    %24 = tpu.matmul %22, %23, %cst_31 {dimension_numbers = #tpu.dot_dimension_numbers<[1], [0], [0], [1], [0, 0, 1, 1], [], []>} : vector<32x96xf32>, vector<96x32xf32>, vector<32x32xf32> -> vector<32x32xf32>
    %c0_32 = arith.constant 0 : index
    %c0_33 = arith.constant 0 : index
    %25 = vector.load %arg5[%c0_32, %c0_33] : memref<1x32xf32, #tpu.memory_space<vmem>>, vector<1x32xf32>
    %26 = vector.broadcast %25 : vector<1x32xf32> to vector<32x32xf32>
    %27 = arith.addf %24, %26 : vector<32x32xf32>
    %cst_34 = arith.constant 0.000000e+00 : f32
    %28 = vector.broadcast %cst_34 : f32 to vector<32x32xf32>
    %29 = arith.maximumf %27, %28 : vector<32x32xf32>
    %30 = vector.shape_cast %29 : vector<32x32xf32> to vector<2x16x32xf32>
    %c0_35 = arith.constant 0 : index
    %c8_36 = arith.constant 8 : index
    %c0_37 = arith.constant 0 : index
    %31 = vector.load %arg12[%c0_35, %c8_36, %c0_37] : memref<2x32x128xf32, #tpu.memory_space<vmem>>, vector<2x16x32xf32>
    tpu.vector_store %arg12[%c0_35, %c8_36, %c0_37], %30 {strides = array<i32>} : memref<2x32x128xf32, #tpu.memory_space<vmem>>, vector<2x16x32xf32>,
    %c0_38 = arith.constant 0 : index
    %c7_39 = arith.constant 7 : index
    %c0_40 = arith.constant 0 : index
    %32 = vector.load %arg12[%c0_38, %c7_39, %c0_40] : memref<2x32x128xf32, #tpu.memory_space<vmem>>, vector<2x16x32xf32>
    %c0_41 = arith.constant 0 : index
    %c9_42 = arith.constant 9 : index
    %c0_43 = arith.constant 0 : index
    %33 = vector.load %arg12[%c0_41, %c9_42, %c0_43] : memref<2x32x128xf32, #tpu.memory_space<vmem>>, vector<2x16x32xf32>
    %34 = tpu.concatenate %32, %30, %33 in 2 : vector<2x16x32xf32>, vector<2x16x32xf32>, vector<2x16x32xf32> -> vector<2x16x96xf32>
    %35 = vector.shape_cast %34 : vector<2x16x96xf32> to vector<32x96xf32>
    %c0_44 = arith.constant 0 : index
    %c0_45 = arith.constant 0 : index
    %36 = vector.load %arg6[%c0_44, %c0_45] : memref<96x32xf32, #tpu.memory_space<vmem>>, vector<96x32xf32>
    %cst_46 = arith.constant dense<0.000000e+00> : vector<32x32xf32>
    %37 = tpu.matmul %35, %36, %cst_46 {dimension_numbers = #tpu.dot_dimension_numbers<[1], [0], [0], [1], [0, 0, 1, 1], [], []>} : vector<32x96xf32>, vector<96x32xf32>, vector<32x32xf32> -> vector<32x32xf32>
    %c0_47 = arith.constant 0 : index
    %c0_48 = arith.constant 0 : index
    %38 = vector.load %arg7[%c0_47, %c0_48] : memref<1x32xf32, #tpu.memory_space<vmem>>, vector<1x32xf32>
    %39 = vector.broadcast %38 : vector<1x32xf32> to vector<32x32xf32>
    %40 = arith.addf %37, %39 : vector<32x32xf32>
    %cst_49 = arith.constant 0.000000e+00 : f32
    %41 = vector.broadcast %cst_49 : f32 to vector<32x32xf32>
    %42 = arith.maximumf %40, %41 : vector<32x32xf32>
    %43 = vector.shape_cast %42 : vector<32x32xf32> to vector<2x16x32xf32>
    %c0_50 = arith.constant 0 : index
    %c8_51 = arith.constant 8 : index
    %c0_52 = arith.constant 0 : index
    %44 = vector.load %arg12[%c0_50, %c8_51, %c0_52] : memref<2x32x128xf32, #tpu.memory_space<vmem>>, vector<2x16x32xf32>
    tpu.vector_store %arg12[%c0_50, %c8_51, %c0_52], %43 {strides = array<i32>} : memref<2x32x128xf32, #tpu.memory_space<vmem>>, vector<2x16x32xf32>,
    %c0_53 = arith.constant 0 : index
    %c7_54 = arith.constant 7 : index
    %c0_55 = arith.constant 0 : index
    %45 = vector.load %arg12[%c0_53, %c7_54, %c0_55] : memref<2x32x128xf32, #tpu.memory_space<vmem>>, vector<2x16x32xf32>
    %c0_56 = arith.constant 0 : index
    %c9_57 = arith.constant 9 : index
    %c0_58 = arith.constant 0 : index
    %46 = vector.load %arg12[%c0_56, %c9_57, %c0_58] : memref<2x32x128xf32, #tpu.memory_space<vmem>>, vector<2x16x32xf32>
    %47 = tpu.concatenate %45, %43, %46 in 2 : vector<2x16x32xf32>, vector<2x16x32xf32>, vector<2x16x32xf32> -> vector<2x16x96xf32>
    %48 = vector.shape_cast %47 : vector<2x16x96xf32> to vector<32x96xf32>
    %c0_59 = arith.constant 0 : index
    %c0_60 = arith.constant 0 : index
    %49 = vector.load %arg8[%c0_59, %c0_60] : memref<96x128xf32, #tpu.memory_space<vmem>>, vector<96x128xf32>
    %cst_61 = arith.constant dense<0.000000e+00> : vector<32x128xf32>
    %50 = tpu.matmul %48, %49, %cst_61 {dimension_numbers = #tpu.dot_dimension_numbers<[1], [0], [0], [1], [0, 0, 1, 1], [], []>} : vector<32x96xf32>, vector<96x128xf32>, vector<32x128xf32> -> vector<32x128xf32>
    %c0_62 = arith.constant 0 : index
    %c0_63 = arith.constant 0 : index
    %51 = vector.load %arg9[%c0_62, %c0_63] : memref<1x128xf32, #tpu.memory_space<vmem>>, vector<1x128xf32>
    %52 = vector.broadcast %51 : vector<1x128xf32> to vector<32x128xf32>
    %53 = arith.addf %50, %52 : vector<32x128xf32>
    %c0_64 = arith.constant 0 : index
    %c0_65 = arith.constant 0 : index
    %54 = vector.load %arg11[%c0_64, %c0_65] : memref<32x128xf32, #tpu.memory_space<vmem>>, vector<32x128xf32>
    tpu.vector_store %arg11[%c0_64, %c0_65], %53 {strides = array<i32>} : memref<32x128xf32, #tpu.memory_space<vmem>>, vector<32x128xf32>,
    %55 = arith.subf %5, %53 : vector<32x128xf32>
    %c0_66 = arith.constant 0 : index
    %c0_67 = arith.constant 0 : index
    %56 = vector.load %arg10[%c0_66, %c0_67] : memref<32x128xf32, #tpu.memory_space<vmem>>, vector<32x128xf32>
    tpu.vector_store %arg10[%c0_66, %c0_67], %55 {strides = array<i32>} : memref<32x128xf32, #tpu.memory_space<vmem>>, vector<32x128xf32>,
    return
  }
  func.func @transform_0(%arg0: i32) -> (i32, i32, i32) {
    %c0_i32 = arith.constant 0 : i32
    %c0_i32_0 = arith.constant 0 : i32
    %c0_i32_1 = arith.constant 0 : i32
    %c0_i32_2 = arith.constant 0 : i32
    return %c0_i32, %c0_i32_0, %c0_i32_1 : i32, i32, i32
  }
  func.func @transform_1(%arg0: i32) -> (i32, i32) {
    %c0_i32 = arith.constant 0 : i32
    %c0_i32_0 = arith.constant 0 : i32
    %c0_i32_1 = arith.constant 0 : i32
    return %c0_i32, %c0_i32_0 : i32, i32
  }
  func.func @transform_2(%arg0: i32) -> (i32, i32) {
    %c0_i32 = arith.constant 0 : i32
    %c0_i32_0 = arith.constant 0 : i32
    %c0_i32_1 = arith.constant 0 : i32
    return %c0_i32, %c0_i32_0 : i32, i32
  }
  func.func @transform_3(%arg0: i32) -> (i32, i32) {
    %c0_i32 = arith.constant 0 : i32
    %c0_i32_0 = arith.constant 0 : i32
    %c0_i32_1 = arith.constant 0 : i32
    return %c0_i32, %c0_i32_0 : i32, i32
  }
  func.func @transform_4(%arg0: i32) -> (i32, i32) {
    %c0_i32 = arith.constant 0 : i32
    %c0_i32_0 = arith.constant 0 : i32
    %c0_i32_1 = arith.constant 0 : i32
    return %c0_i32, %c0_i32_0 : i32, i32
  }
  func.func @transform_5(%arg0: i32) -> (i32, i32) {
    %c0_i32 = arith.constant 0 : i32
    %c0_i32_0 = arith.constant 0 : i32
    %c0_i32_1 = arith.constant 0 : i32
    return %c0_i32, %c0_i32_0 : i32, i32
  }
  func.func @transform_6(%arg0: i32) -> (i32, i32) {
    %c0_i32 = arith.constant 0 : i32
    %c0_i32_0 = arith.constant 0 : i32
    %c0_i32_1 = arith.constant 0 : i32
    return %c0_i32, %c0_i32_0 : i32, i32
  }
  func.func @transform_7(%arg0: i32) -> (i32, i32) {
    %c0_i32 = arith.constant 0 : i32
    %c0_i32_0 = arith.constant 0 : i32
    %c0_i32_1 = arith.constant 0 : i32
    return %c0_i32, %c0_i32_0 : i32, i32
  }
  func.func @transform_8(%arg0: i32) -> (i32, i32) {
    %c0_i32 = arith.constant 0 : i32
    %c0_i32_0 = arith.constant 0 : i32
    %c0_i32_1 = arith.constant 0 : i32
    return %c0_i32, %c0_i32_0 : i32, i32
  }
  func.func @transform_9(%arg0: i32) -> (i32, i32) {
    %c0_i32 = arith.constant 0 : i32
    %c0_i32_0 = arith.constant 0 : i32
    %c0_i32_1 = arith.constant 0 : i32
    return %c0_i32, %c0_i32_0 : i32, i32
  }
  func.func @transform_10(%arg0: i32) -> (i32, i32) {
    %c0_i32 = arith.constant 0 : i32
    %c0_i32_0 = arith.constant 0 : i32
    %c0_i32_1 = arith.constant 0 : i32
    return %c0_i32, %c0_i32_0 : i32, i32
  }
}

</mosaic_0001>

<bundles_post_ra>
// kernel: tpu_custom_call.1
= control target key start
LH: loop header
LB: loop body
LE: loop exit
PB: predicated region body
PF: predicated region fallthrough
CT: control target
= control target key end

     0   :  { %16 = vsyncpa [#allocation4], 0  ;;  %vm48_vm0 = vcmask 31744   ;;  %s1007_s19 = smov 4   ;;  %v1008_v3 = vmov 0.0   ;;  %vm128_vm1 = vcmask 1043456   ;;  %s1320_s0 = inlined_call_operand.vmem [shape: f32[2,16,4], index: 0, kind: input, shape index: {}]   ;;  %s1321_s1 = inlined_call_operand.vmem [shape: f32[12,32], index: 1, kind: input, shape index: {}]   ;;  %s1322_s2 = inlined_call_operand.vmem [shape: f32[1,32], index: 2, kind: input, shape index: {}]   ;;  %s1323_s3 = inlined_call_operand.vmem [shape: f32[96,32], index: 3, kind: input, shape index: {}]   ;;  %s1324_s4 = inlined_call_operand.vmem [shape: f32[1,32], index: 4, kind: input, shape index: {}]   ;;  %s1325_s5 = inlined_call_operand.vmem [shape: f32[96,32], index: 5, kind: input, shape index: {}]   ;;  %s1326_s6 = inlined_call_operand.vmem [shape: f32[1,32], index: 6, kind: input, shape index: {}]   ;;  %s1327_s7 = inlined_call_operand.vmem [shape: f32[96,128], index: 7, kind: input, shape index: {}]   ;;  %s1328_s8 = inlined_call_operand.vmem [shape: f32[1,128], index: 8, kind: input, shape index: {}]   ;;  %s1329_s9 = inlined_call_operand.hbm [shape: f32[32,128], index: 9, kind: output, shape index: {0}]   ;;  %s1330_s10 = inlined_call_operand.hbm [shape: f32[32,128], index: 10, kind: output, shape index: {1}]  }
   0x1   :  { %v44_v0 = vld [vmem:[%s1320_s0] sm:$0xff]  ;;  %v47_v1 = vld [vmem:[%s1320_s0 + $0x18] sm:$0xff]  ;;  %v45_v2 = vld [vmem:[%s1320_s0 + $0x8] sm:$0xff]  ;;  %36 = vst [vmem:[#allocation2] sm:$0xff] %v1008_v3 }
   0x2   :  { %69 = vrot.lane.b32.xlu0 %v44_v0, %s1007_s19  ;;  %37 = vst [vmem:[#allocation2 + $0x8] sm:$0xff] %v1008_v3  ;;  %40 = vst [vmem:[#allocation2 + $0x20] sm:$0xff] %v1008_v3  ;;  %75 = vrot.lane.b32.xlu1 %v47_v1, %s1007_s19  ;;  %v46_v4 = vld [vmem:[%s1320_s0 + $0x10] sm:$0xff]  ;;  %v107_v5 = vld [vmem:[%s1321_s1 + $0x8] sm:$0xf] }
   0x3   :  { %38 = vst [vmem:[#allocation2 + $0x10] sm:$0xff] %v1008_v3  ;;  %39 = vst [vmem:[#allocation2 + $0x18] sm:$0xff] %v1008_v3  ;;  %855 = vmatprep.subr.msk.mxu0 %vm128_vm1, %v107_v5  ;;  %v106_v6 = vld [vmem:[%s1321_s1] sm:$0xff] }
   0x4   :  { %41 = vst [vmem:[#allocation2 + $0x28] sm:$0xff] %v1008_v3  ;;  %42 = vst [vmem:[#allocation2 + $0x30] sm:$0xff] %v1008_v3 }
   0x5   :  { %43 = vst [vmem:[#allocation2 + $0x38] sm:$0xff] %v1008_v3  ;;  %49 = vst.msk [vmem:[#allocation2 + $0x8] sm:$0xff] %vm48_vm0, %v44_v0 }
   0x6   :  { %52 = vst.msk [vmem:[#allocation2 + $0x30] sm:$0xff] %vm48_vm0, %v47_v1  ;;  %50 = vst.msk [vmem:[#allocation2 + $0x10] sm:$0xff] %vm48_vm0, %v45_v2 }
   0x7   :  { %51 = vst.msk [vmem:[#allocation2 + $0x28] sm:$0xff] %vm48_vm0, %v46_v4 }
   0x8   :  { %17 = vsyncpa [#allocation6], 0  ;;  %856 = vmatpush3.msk.msra.mxu0 %vm128_vm1, %v107_v5  ;;  %71 = vrot.lane.b32.xlu0 %v45_v2, %s1007_s19  ;;  %s1009_s0 = smov 8   ;;  %vm101_vm2 = vcmask 64512   ;;  %vm115_vm3 = vcmask 97280   ;;  %v286_v31 = vld [vmem:[%s1323_s3 + $0x58] sm:$0xff] }
   0x9   :  { %857 = vmatprep.subr.mxu0 %v106_v6  ;;  %v285_v32 = vld [vmem:[%s1323_s3 + $0x50] sm:$0xff]  ;;  %865 = vmatprep.subr.mxu1 %v286_v31  ;;  %v284_v33 = vld [vmem:[%s1323_s3 + $0x48] sm:$0xff]  ;;  %v283_v34 = vld [vmem:[%s1323_s3 + $0x40] sm:$0xff]  ;;  %vm221_vm4 = vcmask 261120   ;;  %vm270_vm5 = vcmask 523264   ;;  %vm294_vm6 = vcmask 785408  }
   0xa   :  { %858 = vmatpush3.msra.mxu0 %v106_v6  ;;  %866 = vmatpush3.msra.mxu1 %v286_v31  ;;  %v282_v35 = vld [vmem:[%s1323_s3 + $0x38] sm:$0xff]  ;;  %v281_v36 = vld [vmem:[%s1323_s3 + $0x30] sm:$0xff]  ;;  %v280_v37 = vld [vmem:[%s1323_s3 + $0x28] sm:$0xff]  ;;  %s1013_s16 = smov [#allocation3]  }
   0xb   :  { %867 = vmatprep.subr.mxu1 %v285_v32  ;;  %v279_v38 = vld [vmem:[%s1323_s3 + $0x20] sm:$0xff]  ;;  %v278_v39 = vld [vmem:[%s1323_s3 + $0x18] sm:$0xff]  ;;  %v277_v40 = vld [vmem:[%s1323_s3 + $0x10] sm:$0xff]  ;;  %s753_s17 = sshll.u32 %s1013_s16, 4  ;;  %s754_s17 = int_to_ptr.vmem [resolvable:$true] %s753_s17 }
   0xc   :  { %73 = vrot.lane.b32.xlu0 %v46_v4, %s1007_s19  ;;  %v57_v14 = vld [vmem:[#allocation2 + $0x7] sm:$0xff]  ;;  %868 = vmatpush3.msra.mxu1 %v285_v32  ;;  %v780_v41 = vld [vmem:[%s1322_s2] ss:$0 sm:$0xff]  ;;  %s1010_s2 = smov 32  }
   0xd   :  { %v61_v7 = vld [vmem:[#allocation2 + $0x9] sm:$0xff]  ;;  %v62_v9 = vld [vmem:[#allocation2 + $0x11] sm:$0xff]  ;;  %869 = vmatprep.subr.mxu1 %v284_v33  ;;  %v275_v45 = vld [vmem:[%s1323_s3] sm:$0xff] }
   0xe   :  { %v63_v8 = vld [vmem:[#allocation2 + $0x29] sm:$0xff]  ;;  %85 = vrot.lane.b32.xlu1 %v61_v7, %s1009_s0  ;;  %v64_v10 = vld [vmem:[#allocation2 + $0x31] sm:$0xff]  ;;  %870 = vmatpush3.msra.mxu1 %v284_v33 }
   0xf   :  { %v59_v16 = vld [vmem:[#allocation2 + $0x27] sm:$0xff]  ;;  %v58_v19 = vld [vmem:[#allocation2 + $0xf] sm:$0xff]  ;;  %871 = vmatprep.subr.mxu1 %v283_v34 }
  0x10   :  { %89 = vrot.lane.b32.xlu0 %v63_v8, %s1009_s0  ;;  %v60_v26 = vld [vmem:[#allocation2 + $0x2f] sm:$0xff]  ;;  %872 = vmatpush3.msra.mxu1 %v283_v34  ;;  %v448_v34 = vld [vmem:[%s1325_s5] sm:$0xff] }
  0x11   :  { %873 = vmatprep.subr.mxu1 %v282_v35  ;;  %v276_v42 = vld [vmem:[%s1323_s3 + $0x8] sm:$0xff]  ;;  %v1147_v46 = vld [vmem:[#allocation2 + $0x10] sm:$0xff]  ;;  %s1011_s3 = smov 64  }
  0x12   :  { %87 = vrot.lane.b32.xlu1 %v62_v9, %s1009_s0  ;;  %874 = vmatpush3.msra.mxu1 %v282_v35  ;;  %v1149_v50 = vld [vmem:[#allocation2 + $0x8] sm:$0xff]  ;;  %v1153_v54 = vld [vmem:[#allocation2 + $0x30] sm:$0xff] }
  0x13   :  { %875 = vmatprep.subr.mxu1 %v281_v36  ;;  %v1157_v58 = vld [vmem:[#allocation2 + $0x28] sm:$0xff] }
  0x14   :  { %876 = vmatpush3.msra.mxu1 %v281_v36  ;;  %v449_v31 = vld [vmem:[%s1325_s5 + $0x8] sm:$0xff] }
  0x15   :  { %877 = vmatprep.subr.mxu1 %v280_v37 }
  0x16   :  { %91 = vrot.lane.b32.xlu1 %v64_v10, %s1009_s0  ;;  %878 = vmatpush3.msra.mxu1 %v280_v37 }
  0x17   :  { %879 = vmatprep.subr.mxu1 %v279_v38 }
  0x18   :  { %880 = vmatpush3.msra.mxu1 %v279_v38 }
  0x19   :  { %881 = vmatprep.subr.mxu1 %v278_v39 }
  0x1a   :  { %882 = vmatpush3.msra.mxu1 %v278_v39 }
  0x1b   :  { %883 = vmatprep.subr.mxu1 %v277_v40 }
  0x1c   :  { %884 = vmatpush3.msra.mxu1 %v277_v40 }
  0x1d   :  { %885 = vmatprep.subr.mxu1 %v276_v42 }
  0x1e   :  { %886 = vmatpush3.msra.mxu1 %v276_v42 }
  0x1f   :  { %887 = vmatprep.subr.mxu1 %v275_v45 }
  0x20   :  { %888 = vmatpush3.msra.mxu1 %v275_v45 }
  0x74   :  { %v70_v11 = vpop.permute.xlu0 %69  ;;  %v76_v12 = vpop.permute.xlu1 %75 }
  0x75   :  { %v97_v17 = vsel %vm48_vm0, %v57_v14, %v70_v11  ;;  %v100_v28 = vsel %vm48_vm0, %v60_v26, %v76_v12  ;;  %v453_v26 = vld [vmem:[%s1325_s5 + $0x28] sm:$0xff] }
  0x7a   :  { %v72_v13 = vpop.permute.xlu0 %71 }
  0x7b   :  { %v98_v23 = vsel %vm48_vm0, %v58_v19, %v72_v13 }
  0x7e   :  { %v74_v15 = vpop.permute.xlu0 %73 }
  0x7f   :  { %v99_v20 = vsel %vm48_vm0, %v59_v16, %v74_v15 }
  0x80   :  { %v86_v18 = vpop.permute.xlu1 %85 }
  0x81   :  { %v102_v21 = vsel %vm101_vm2, %v97_v17, %v86_v18 }
  0x82   :  { %859 = vmatprep.mubr.msk.f32.mxu0 %vm115_vm3, %v102_v21  ;;  %v90_v22 = vpop.permute.xlu0 %89  ;;  %v458_v21 = vld [vmem:[%s1325_s5 + $0x50] sm:$0xff] }
  0x83   :  { %v104_v24 = vsel %vm101_vm2, %v99_v20, %v90_v22  ;;  %v459_v20 = vld [vmem:[%s1325_s5 + $0x58] sm:$0xff]  ;;  %v457_v22 = vld [vmem:[%s1325_s5 + $0x48] sm:$0xff] }
  0x84   :  { %v88_v25 = vpop.permute.xlu1 %87  ;;  %895 = vmatprep.subr.mxu0 %v459_v20 }
  0x85   :  { %v103_v27 = vsel %vm101_vm2, %v98_v23, %v88_v25  ;;  %v456_v23 = vld [vmem:[%s1325_s5 + $0x40] sm:$0xff]  ;;  %v454_v25 = vld [vmem:[%s1325_s5 + $0x30] sm:$0xff] }
  0x86   :  { %860 = vmatmul.mubr.msk.f32.vlgmr.msra.gmra.mxu0 %vm115_vm3, %v103_v27  ;;  %v452_v27 = vld [vmem:[%s1325_s5 + $0x20] sm:$0xff] }
  0x87   :  { %862 = vmatprep.mubr.msk.f32.mxu0 %vm115_vm3, %v104_v24  ;;  %896 = vmatpush3.msra.mxu0 %v459_v20  ;;  %v455_v24 = vld [vmem:[%s1325_s5 + $0x38] sm:$0xff]  ;;  %v621_v20 = vld [vmem:[%s1327_s7 + $0x8] sm:$0xff] }
  0x88   :  { %v92_v29 = vpop.permute.xlu1 %91  ;;  %897 = vmatprep.subr.mxu0 %v458_v21 }
  0x89   :  { %v105_v30 = vsel %vm101_vm2, %v100_v28, %v92_v29  ;;  %898 = vmatpush3.msra.mxu0 %v458_v21  ;;  %v451_v28 = vld [vmem:[%s1325_s5 + $0x18] sm:$0xff]  ;;  %v450_v29 = vld [vmem:[%s1325_s5 + $0x10] sm:$0xff] }
  0x8a   :  { %863 = vmatmul.mubr.msk.f32.gmra.mxu0 %vm115_vm3, %v105_v30  ;;  %899 = vmatprep.subr.mxu0 %v457_v22  ;;  %v786_v30 = vld [vmem:[%s1324_s4] ss:$0 sm:$0xff] }
  0x8b   :  { %900 = vmatpush3.msra.mxu0 %v457_v22 }
  0x8c   :  { %901 = vmatprep.subr.mxu0 %v456_v23 }
  0x8d   :  { %902 = vmatpush3.msra.mxu0 %v456_v23  ;;  %v620_v23 = vld [vmem:[%s1327_s7] sm:$0xff] }
  0x8e   :  { %903 = vmatprep.subr.mxu0 %v455_v24 }
  0x8f   :  { %904 = vmatpush3.msra.mxu0 %v455_v24 }
  0x90   :  { %905 = vmatprep.subr.mxu0 %v454_v25 }
  0x91   :  { %906 = vmatpush3.msra.mxu0 %v454_v25 }
  0x92   :  { %907 = vmatprep.subr.mxu0 %v453_v26 }
  0x93   :  { %908 = vmatpush3.msra.mxu0 %v453_v26 }
  0x94   :  { %909 = vmatprep.subr.mxu0 %v452_v27 }
  0x95   :  { %910 = vmatpush3.msra.mxu0 %v452_v27 }
  0x96   :  { %911 = vmatprep.subr.mxu0 %v451_v28 }
  0x97   :  { %912 = vmatpush3.msra.mxu0 %v451_v28 }
  0x98   :  { %913 = vmatprep.subr.mxu0 %v450_v29 }
  0x99   :  { %914 = vmatpush3.msra.mxu0 %v450_v29 }
  0x9a   :  { %915 = vmatprep.subr.mxu0 %v449_v31 }
  0x9b   :  { %916 = vmatpush3.msra.mxu0 %v449_v31 }
  0x9c   :  { %917 = vmatprep.subr.mxu0 %v448_v34 }
  0x9d   :  { %918 = vmatpush3.msra.mxu0 %v448_v34 }
 0x146   :  { %v861_v43 = vpop.f32.mrf.mxu0 }
 0x147   :  { %v204_v44 = vadd.f32 %v861_v43, %v780_v41 }
 0x148   :  { %v198_v47 = vpop.f32.mrf.mxu0 }
 0x149   :  { %v218_v48 = vmax.f32 %v204_v44, 0.0  ;;  %v199_v49 = vadd.f32 %v780_v41, %v198_v47 }
 0x14a   :  { %v864_v51 = vpop.f32.mrf.mxu0 }
 0x14b   :  { %223 = vst.msk [vmem:[#allocation2 + $0x10] sm:$0xff] %vm221_vm4, %v218_v48  ;;  %v217_v52 = vmax.f32 %v199_v49, 0.0  ;;  %v214_v53 = vadd.f32 %v864_v51, %v780_v41  ;;  %240 = vrot.lane.b32.xlu1 %v218_v48, %s1010_s2 }
 0x14c   :  { %v208_v55 = vpop.f32.mrf.mxu0 }
 0x14d   :  { %222 = vst.msk [vmem:[#allocation2 + $0x8] sm:$0xff] %vm221_vm4, %v217_v52  ;;  %v220_v56 = vmax.f32 %v214_v53, 0.0  ;;  %v209_v57 = vadd.f32 %v780_v41, %v208_v55  ;;  %238 = vrot.lane.b32.xlu0 %v217_v52, %s1010_s2 }
 0x14f   :  { %225 = vst.msk [vmem:[#allocation2 + $0x30] sm:$0xff] %vm221_vm4, %v220_v56  ;;  %v219_v59 = vmax.f32 %v209_v57, 0.0  ;;  %244 = vrot.lane.b32.xlu1 %v220_v56, %s1010_s2 }
 0x151   :  { %224 = vst.msk [vmem:[#allocation2 + $0x28] sm:$0xff] %vm221_vm4, %v219_v59  ;;  %242 = vrot.lane.b32.xlu0 %v219_v59, %s1010_s2 }
 0x152   :  { %v231_v60 = vld [vmem:[#allocation2 + $0x11] sm:$0xff] }
 0x153   :  { %256 = vrot.lane.b32.xlu1 %v231_v60, %s1011_s3 }
 0x154   :  { %v230_v61 = vld [vmem:[#allocation2 + $0x9] sm:$0xff] }
 0x155   :  { %254 = vrot.lane.b32.xlu0 %v230_v61, %s1011_s3  ;;  %v226_v5 = vld [vmem:[#allocation2 + $0x7] sm:$0xff]  ;;  %v227_v6 = vld [vmem:[#allocation2 + $0xf] sm:$0xff] }
 0x156   :  { %v233_v62 = vld [vmem:[#allocation2 + $0x31] sm:$0xff] }
 0x157   :  { %260 = vrot.lane.b32.xlu1 %v233_v62, %s1011_s3 }
 0x158   :  { %v232_v63 = vld [vmem:[#allocation2 + $0x29] sm:$0xff] }
 0x159   :  { %258 = vrot.lane.b32.xlu0 %v232_v63, %s1011_s3  ;;  %v228_v12 = vld [vmem:[#allocation2 + $0x27] sm:$0xff]  ;;  %v229_v14 = vld [vmem:[#allocation2 + $0x2f] sm:$0xff] }
 0x1bd   :  { %v241_v0 = vpop.permute.xlu1 %240 }
 0x1be   :  { %v267_v9 = vsel %vm221_vm4, %v227_v6, %v241_v0 }
 0x1bf   :  { %v239_v1 = vpop.permute.xlu0 %238 }
 0x1c0   :  { %v266_v7 = vsel %vm221_vm4, %v226_v5, %v239_v1 }
 0x1c1   :  { %v245_v2 = vpop.permute.xlu1 %244 }
 0x1c2   :  { %v269_v17 = vsel %vm221_vm4, %v229_v14, %v245_v2  ;;  %v626_v14 = vld [vmem:[%s1327_s7 + $0x30] sm:$0xff] }
 0x1c3   :  { %v243_v3 = vpop.permute.xlu0 %242 }
 0x1c4   :  { %v268_v15 = vsel %vm221_vm4, %v228_v12, %v243_v3  ;;  %v628_v12 = vld [vmem:[%s1327_s7 + $0x40] sm:$0xff] }
 0x1c5   :  { %v257_v4 = vpop.permute.xlu1 %256 }
 0x1c6   :  { %v272_v11 = vsel %vm270_vm5, %v267_v9, %v257_v4  ;;  %v631_v9 = vld [vmem:[%s1327_s7 + $0x58] sm:$0xff] }
 0x1c7   :  { %v255_v8 = vpop.permute.xlu0 %254  ;;  %925 = vmatprep.subr.mxu1 %v631_v9 }
 0x1c8   :  { %v271_v10 = vsel %vm270_vm5, %v266_v7, %v255_v8 }
 0x1c9   :  { %889 = vmatprep.mubr.msk.f32.mxu1 %vm294_vm6, %v271_v10  ;;  %v261_v13 = vpop.permute.xlu1 %260  ;;  %v630_v10 = vld [vmem:[%s1327_s7 + $0x50] sm:$0xff] }
 0x1ca   :  { %890 = vmatmul.mubr.msk.f32.vlgmr.msra.gmra.mxu1 %vm294_vm6, %v272_v11  ;;  %v274_v19 = vsel %vm270_vm5, %v269_v17, %v261_v13  ;;  %v629_v11 = vld [vmem:[%s1327_s7 + $0x48] sm:$0xff]  ;;  %v627_v13 = vld [vmem:[%s1327_s7 + $0x38] sm:$0xff] }
 0x1cb   :  { %v259_v16 = vpop.permute.xlu0 %258  ;;  %926 = vmatpush3.msra.mxu1 %v631_v9  ;;  %v623_v17 = vld [vmem:[%s1327_s7 + $0x18] sm:$0xff] }
 0x1cc   :  { %v273_v18 = vsel %vm270_vm5, %v268_v15, %v259_v16  ;;  %927 = vmatprep.subr.mxu1 %v630_v10  ;;  %v625_v15 = vld [vmem:[%s1327_s7 + $0x28] sm:$0xff]  ;;  %v624_v16 = vld [vmem:[%s1327_s7 + $0x20] sm:$0xff] }
 0x1cd   :  { %892 = vmatprep.mubr.msk.f32.mxu1 %vm294_vm6, %v273_v18  ;;  %928 = vmatpush3.msra.mxu1 %v630_v10  ;;  %v622_v18 = vld [vmem:[%s1327_s7 + $0x10] sm:$0xff] }
 0x1ce   :  { %893 = vmatmul.mubr.msk.f32.gmra.mxu1 %vm294_vm6, %v274_v19  ;;  %929 = vmatprep.subr.mxu1 %v629_v11  ;;  %v791_v19 = vld [vmem:[%s1326_s6] ss:$0 sm:$0xff] }
 0x1cf   :  { %930 = vmatpush3.msra.mxu1 %v629_v11 }
 0x1d0   :  { %931 = vmatprep.subr.mxu1 %v628_v12 }
 0x1d1   :  { %932 = vmatpush3.msra.mxu1 %v628_v12 }
 0x1d2   :  { %933 = vmatprep.subr.mxu1 %v627_v13 }
 0x1d3   :  { %934 = vmatpush3.msra.mxu1 %v627_v13 }
 0x1d4   :  { %935 = vmatprep.subr.mxu1 %v626_v14 }
 0x1d5   :  { %936 = vmatpush3.msra.mxu1 %v626_v14 }
 0x1d6   :  { %937 = vmatprep.subr.mxu1 %v625_v15 }
 0x1d7   :  { %938 = vmatpush3.msra.mxu1 %v625_v15 }
 0x1d8   :  { %939 = vmatprep.subr.mxu1 %v624_v16 }
 0x1d9   :  { %940 = vmatpush3.msra.mxu1 %v624_v16 }
 0x1da   :  { %941 = vmatprep.subr.mxu1 %v623_v17 }
 0x1db   :  { %942 = vmatpush3.msra.mxu1 %v623_v17 }
 0x1dc   :  { %943 = vmatprep.subr.mxu1 %v622_v18 }
 0x1dd   :  { %944 = vmatpush3.msra.mxu1 %v622_v18 }
 0x1de   :  { %945 = vmatprep.subr.mxu1 %v621_v20 }
 0x1df   :  { %946 = vmatpush3.msra.mxu1 %v621_v20 }
 0x1e0   :  { %947 = vmatprep.subr.mxu1 %v620_v23 }
 0x1e1   :  { %948 = vmatpush3.msra.mxu1 %v620_v23 }
 0x28a   :  { %v891_v32 = vpop.f32.mrf.mxu1 }
 0x28b   :  { %v379_v33 = vadd.f32 %v891_v32, %v786_v30 }
 0x28c   :  { %v373_v35 = vpop.f32.mrf.mxu1 }
 0x28d   :  { %v393_v36 = vmax.f32 %v379_v33, 0.0  ;;  %v374_v37 = vadd.f32 %v786_v30, %v373_v35 }
 0x28e   :  { %v894_v38 = vpop.f32.mrf.mxu1 }
 0x28f   :  { %397 = vst.msk [vmem:[#allocation2 + $0x10] sm:$0xff] %vm221_vm4, %v393_v36  ;;  %v392_v39 = vmax.f32 %v374_v37, 0.0  ;;  %v389_v40 = vadd.f32 %v894_v38, %v786_v30  ;;  %414 = vrot.lane.b32.xlu1 %v393_v36, %s1010_s2 }
 0x290   :  { %v383_v41 = vpop.f32.mrf.mxu1 }
 0x291   :  { %396 = vst.msk [vmem:[#allocation2 + $0x8] sm:$0xff] %vm221_vm4, %v392_v39  ;;  %v395_v42 = vmax.f32 %v389_v40, 0.0  ;;  %v384_v43 = vadd.f32 %v786_v30, %v383_v41  ;;  %412 = vrot.lane.b32.xlu0 %v392_v39, %s1010_s2 }
 0x293   :  { %399 = vst.msk [vmem:[#allocation2 + $0x30] sm:$0xff] %vm221_vm4, %v395_v42  ;;  %v394_v44 = vmax.f32 %v384_v43, 0.0  ;;  %418 = vrot.lane.b32.xlu1 %v395_v42, %s1010_s2 }
 0x295   :  { %398 = vst.msk [vmem:[#allocation2 + $0x28] sm:$0xff] %vm221_vm4, %v394_v44  ;;  %416 = vrot.lane.b32.xlu0 %v394_v44, %s1010_s2 }
 0x296   :  { %v405_v45 = vld [vmem:[#allocation2 + $0x11] sm:$0xff] }
 0x297   :  { %430 = vrot.lane.b32.xlu1 %v405_v45, %s1011_s3 }
 0x298   :  { %v404_v47 = vld [vmem:[#allocation2 + $0x9] sm:$0xff] }
 0x299   :  { %428 = vrot.lane.b32.xlu0 %v404_v47, %s1011_s3  ;;  %v400_v57 = vld [vmem:[#allocation2 + $0x7] sm:$0xff]  ;;  %v401_v59 = vld [vmem:[#allocation2 + $0xf] sm:$0xff] }
 0x29a   :  { %v407_v48 = vld [vmem:[#allocation2 + $0x31] sm:$0xff] }
 0x29b   :  { %434 = vrot.lane.b32.xlu1 %v407_v48, %s1011_s3 }
 0x29c   :  { %v406_v49 = vld [vmem:[#allocation2 + $0x29] sm:$0xff] }
 0x29d   :  { %432 = vrot.lane.b32.xlu0 %v406_v49, %s1011_s3  ;;  %v402_v1 = vld [vmem:[#allocation2 + $0x27] sm:$0xff]  ;;  %v403_v3 = vld [vmem:[#allocation2 + $0x2f] sm:$0xff] }
 0x301   :  { %v415_v51 = vpop.permute.xlu1 %414 }
 0x302   :  { %v441_v62 = vsel %vm221_vm4, %v401_v59, %v415_v51 }
 0x303   :  { %v413_v52 = vpop.permute.xlu0 %412 }
 0x304   :  { %v440_v60 = vsel %vm221_vm4, %v400_v57, %v413_v52 }
 0x305   :  { %v419_v53 = vpop.permute.xlu1 %418 }
 0x306   :  { %v443_v6 = vsel %vm221_vm4, %v403_v3, %v419_v53 }
 0x307   :  { %v417_v55 = vpop.permute.xlu0 %416 }
 0x308   :  { %v442_v4 = vsel %vm221_vm4, %v402_v1, %v417_v55 }
 0x309   :  { %v431_v56 = vpop.permute.xlu1 %430 }
 0x30a   :  { %v445_v0 = vsel %vm270_vm5, %v441_v62, %v431_v56  ;;  %v796_v62 = vld [vmem:[%s1328_s8] ss:$0 sm:$0xff] }
 0x30b   :  { %v429_v61 = vpop.permute.xlu0 %428 }
 0x30c   :  { %v444_v63 = vsel %vm270_vm5, %v440_v60, %v429_v61 }
 0x30d   :  { %919 = vmatprep.mubr.msk.f32.mxu0 %vm294_vm6, %v444_v63  ;;  %v435_v2 = vpop.permute.xlu1 %434 }
 0x30e   :  { %920 = vmatmul.mubr.msk.f32.vlgmr.msra.gmra.mxu0 %vm294_vm6, %v445_v0  ;;  %v447_v8 = vsel %vm270_vm5, %v443_v6, %v435_v2 }
 0x30f   :  { %v433_v5 = vpop.permute.xlu0 %432 }
 0x310   :  { %v446_v7 = vsel %vm270_vm5, %v442_v4, %v433_v5 }
 0x311   :  { %922 = vmatprep.mubr.msk.f32.mxu0 %vm294_vm6, %v446_v7 }
 0x312   :  { %923 = vmatmul.mubr.msk.f32.gmra.mxu0 %vm294_vm6, %v447_v8 }
 0x3ce   :  { %v921_v21 = vpop.f32.mrf.mxu0 }
 0x3cf   :  { %v551_v22 = vadd.f32 %v921_v21, %v791_v19 }
 0x3d0   :  { %v545_v24 = vpop.f32.mrf.mxu0 }
 0x3d1   :  { %v565_v25 = vmax.f32 %v551_v22, 0.0  ;;  %v546_v26 = vadd.f32 %v791_v19, %v545_v24 }
 0x3d2   :  { %v924_v27 = vpop.f32.mrf.mxu0 }
 0x3d3   :  { %569 = vst.msk [vmem:[#allocation2 + $0x10] sm:$0xff] %vm221_vm4, %v565_v25  ;;  %v564_v28 = vmax.f32 %v546_v26, 0.0  ;;  %v561_v29 = vadd.f32 %v924_v27, %v791_v19  ;;  %586 = vrot.lane.b32.xlu1 %v565_v25, %s1010_s2 }
 0x3d4   :  { %v555_v30 = vpop.f32.mrf.mxu0 }
 0x3d5   :  { %568 = vst.msk [vmem:[#allocation2 + $0x8] sm:$0xff] %vm221_vm4, %v564_v28  ;;  %v567_v31 = vmax.f32 %v561_v29, 0.0  ;;  %v556_v32 = vadd.f32 %v791_v19, %v555_v30  ;;  %584 = vrot.lane.b32.xlu0 %v564_v28, %s1010_s2 }
 0x3d7   :  { %571 = vst.msk [vmem:[#allocation2 + $0x30] sm:$0xff] %vm221_vm4, %v567_v31  ;;  %v566_v33 = vmax.f32 %v556_v32, 0.0  ;;  %590 = vrot.lane.b32.xlu1 %v567_v31, %s1010_s2 }
 0x3d9   :  { %570 = vst.msk [vmem:[#allocation2 + $0x28] sm:$0xff] %vm221_vm4, %v566_v33  ;;  %588 = vrot.lane.b32.xlu0 %v566_v33, %s1010_s2  ;;  %s1012_s2 = smov [#allocation5]  }
 0x3da   :  { %v577_v34 = vld [vmem:[#allocation2 + $0x11] sm:$0xff] }
 0x3db   :  { %602 = vrot.lane.b32.xlu1 %v577_v34, %s1011_s3 }
 0x3dc   :  { %v576_v35 = vld [vmem:[#allocation2 + $0x9] sm:$0xff] }
 0x3dd   :  { %600 = vrot.lane.b32.xlu0 %v576_v35, %s1011_s3  ;;  %v572_v43 = vld [vmem:[#allocation2 + $0x7] sm:$0xff]  ;;  %v573_v44 = vld [vmem:[#allocation2 + $0xf] sm:$0xff] }
 0x3de   :  { %v579_v36 = vld [vmem:[#allocation2 + $0x31] sm:$0xff] }
 0x3df   :  { %606 = vrot.lane.b32.xlu1 %v579_v36, %s1011_s3 }
 0x3e0   :  { %v578_v37 = vld [vmem:[#allocation2 + $0x29] sm:$0xff] }
 0x3e1   :  { %604 = vrot.lane.b32.xlu0 %v578_v37, %s1011_s3  ;;  %v574_v52 = vld [vmem:[#allocation2 + $0x27] sm:$0xff]  ;;  %v575_v55 = vld [vmem:[#allocation2 + $0x2f] sm:$0xff]  ;;  %s765_s3 = sshll.u32 %s1012_s2, 4  ;;  %s766_s3 = int_to_ptr.vmem [resolvable:$true] %s765_s3 }
 0x3e2   :  { %s963_s8 = scalar_lea.vmem %s766_s3, 512  ;;  %p968_p1 = scmp.lt.s32.totalorder %s766_s3, %s766_s3 }
 0x3e3   :  { %p964_p0 = scmp.ne.s32.totalorder %s766_s3, %s963_s8  ;;  %p969_p2 = scmp.lt.s32.totalorder %s963_s8, %s963_s8 }
 0x3e5   :  { %p970_p3 = por %p969_p2, %p968_p1 }
 0x3e7   :  { %p971_p4 = pnand %p970_p3, %p964_p0 }
 0x445   :  { %v587_v38 = vpop.permute.xlu1 %586 }
 0x446   :  { %v613_v48 = vsel %vm221_vm4, %v573_v44, %v587_v38 }
 0x447   :  { %v585_v39 = vpop.permute.xlu0 %584 }
 0x448   :  { %v612_v45 = vsel %vm221_vm4, %v572_v43, %v585_v39 }
 0x449   :  { %v591_v40 = vpop.permute.xlu1 %590 }
 0x44a   :  { %v615_v59 = vsel %vm221_vm4, %v575_v55, %v591_v40 }
 0x44b   :  { %v589_v41 = vpop.permute.xlu0 %588 }
 0x44c   :  { %v614_v56 = vsel %vm221_vm4, %v574_v52, %v589_v41 }
 0x44d   :  { %v603_v42 = vpop.permute.xlu1 %602 }
 0x44e   :  { %v617_v51 = vsel %vm270_vm5, %v613_v48, %v603_v42 }
 0x44f   :  { %v601_v47 = vpop.permute.xlu0 %600 }
 0x450   :  { %v616_v49 = vsel %vm270_vm5, %v612_v45, %v601_v47 }
 0x451   :  { %949 = vmatprep.mubr.msk.f32.mxu1 %vm294_vm6, %v616_v49  ;;  %v607_v53 = vpop.permute.xlu1 %606 }
 0x452   :  { %950 = vmatmul.mubr.msk.f32.vlgmr.msra.gmra.mxu1 %vm294_vm6, %v617_v51  ;;  %v619_v61 = vsel %vm270_vm5, %v615_v59, %v607_v53 }
 0x453   :  { %v605_v57 = vpop.permute.xlu0 %604 }
 0x454   :  { %v618_v60 = vsel %vm270_vm5, %v614_v56, %v605_v57 }
 0x455   :  { %952 = vmatprep.mubr.msk.f32.mxu1 %vm294_vm6, %v618_v60 }
 0x456   :  { %953 = vmatmul.mubr.msk.f32.gmra.mxu1 %vm294_vm6, %v619_v61 }
 0x512   :  { %v951_v63 = vpop.f32.mrf.mxu1 }
 0x513   :  { %v723_v0 = vadd.f32 %v951_v63, %v796_v62 }
 0x514   :  { %v717_v1 = vpop.f32.mrf.mxu1 }
 0x515   :  { %737 = vst [vmem:[#allocation5 + $0x8] sm:$0xff] %v723_v0  ;;  %v741_v2 = vsub.f32 %v1147_v46, %v723_v0  ;;  %v718_v3 = vadd.f32 %v796_v62, %v717_v1 }
 0x516   :  { %v954_v4 = vpop.f32.mrf.mxu1 }
 0x517   :  { %745 = vst [vmem:[#allocation3 + $0x8] sm:$0xff] %v741_v2  ;;  %736 = vst [vmem:[#allocation5] sm:$0xff] %v718_v3  ;;  %v740_v5 = vsub.f32 %v1149_v50, %v718_v3  ;;  %v733_v6 = vadd.f32 %v954_v4, %v796_v62 }
 0x518   :  { %v727_v7 = vpop.f32.mrf.mxu1 }
 0x519   :  { %744 = vst [vmem:[#allocation3] sm:$0xff] %v740_v5  ;;  %739 = vst [vmem:[#allocation5 + $0x18] sm:$0xff] %v733_v6  ;;  %v743_v8 = vsub.f32 %v1153_v54, %v733_v6  ;;  %v728_v9 = vadd.f32 %v796_v62, %v727_v7 }
 0x51b   :  { %747 = vst [vmem:[#allocation3 + $0x18] sm:$0xff] %v743_v8  ;;  %738 = vst [vmem:[#allocation5 + $0x10] sm:$0xff] %v728_v9  ;;  %v742_v46 = vsub.f32 %v1157_v58, %v728_v9 }
 0x51c   :  { %974 = shalt.err (!%p971_p4)
}
 0x51d   :  { %s1014_s18 = smov 128   ;;  %746 = vst [vmem:[#allocation3 + $0x10] sm:$0xff] %v742_v46  ;;  %s983_s21 = scalar_lea.vmem %s754_s17, 512 }
 0x51e   :  { %771 = dma.vmem_to_hbm [thread:$0]  %s766_s3, 512, %s1330_s10, [#allocation6], %s1014_s18, %s1014_s18, %s1009_s0  }
 0x51f   :  { %p984_p5 = scmp.ne.s32.totalorder %s754_s17, %s983_s21  ;;  %p988_p6 = scmp.lt.s32.totalorder %s754_s17, %s754_s17 }
 0x520   :  { %p989_p7 = scmp.lt.s32.totalorder %s983_s21, %s983_s21 }
 0x522   :  { %p990_p8 = por %p989_p7, %p988_p6 }
 0x524   :  { %p991_p9 = pnand %p990_p8, %p984_p5 }
 0x526   :  { %994 = shalt.err (!%p991_p9)
}
 0x527   :  { %759 = dma.vmem_to_hbm [thread:$0]  %s754_s17, 512, %s1329_s9, [#allocation4], %s1014_s18, %s1014_s18, %s1009_s0  }
 0x528   :  { %1003 = dma.done.wait [#allocation4], 512  }
 0x529   :  { %1004 = vsyncadd [#allocation4], 4294966784 }
 0x52a   :  { %1005 = dma.done.wait [#allocation6], 512  }
 0x52b   :  { %1006 = vsyncadd [#allocation6], 4294966784 }
 0x52c   :  { %778 = vsyncpa [#allocation4], 1 }
 0x52d   :  { %779 = vsyncpa [#allocation6], 1 }

</bundles_post_ra>
